<compile_context>
chip_gen: v7x
topology: tpu7x:2x2x1
jax: 0.10.0
libtpu: 0.0.40
codegen_flags: <defaults>
</compile_context>

<pallas_src>
import jax
import jax.numpy as jnp
from jax.experimental import pallas as pl
from jax.experimental.pallas import tpu as pltpu


def _coord_att_kernel(x_ref, pool_ref, bh_mat_ref, bw_mat_ref,
                      w1_ref, b1_ref, wh_ref, bh_bias_ref, ww_ref, bw_bias_ref,
                      out_ref):
    # x_ref: (nb*C, H*W) lane-dense slab (spatial flattened onto lanes).
    x = x_ref[...]

    # Coordinate pooling (pool_h + pool_w) as a single MXU matmul against a
    # constant pooling matrix: pooled[:, :H] = mean over W, pooled[:, H:] =
    # mean over H -- i.e. the concatenated [x_h ; x_w] of the reference.
    pooled = jnp.dot(x.astype(jnp.float32), pool_ref[...],
                     preferred_element_type=jnp.float32)          # (nb*C, H+W)

    # conv1 (1x1, BN folded in) on the concatenated pooled features.
    y = jnp.dot(w1_ref[...], pooled,
                preferred_element_type=jnp.float32) + b1_ref[...]  # (nb*mip, H+W)
    # h_swish: y * relu6(y + 3) / 6
    y = y * (jnp.clip(y + 3.0, 0.0, 6.0) * (1.0 / 6.0))

    # conv_h / conv_w (1x1) + sigmoid.  Applied over the whole (H+W) axis to
    # avoid a non-aligned lane split; the 0/1 broadcast matrices below select
    # only the valid halves (first H columns for a_h, last W for a_w).
    a_h = jax.nn.sigmoid(
        jnp.dot(wh_ref[...], y, preferred_element_type=jnp.float32)
        + bh_bias_ref[...])                                        # (nb*C, H+W)
    a_w = jax.nn.sigmoid(
        jnp.dot(ww_ref[...], y, preferred_element_type=jnp.float32)
        + bw_bias_ref[...])                                        # (nb*C, H+W)

    # Broadcast back to the flattened H*W lane axis via 0/1 matmuls (MXU),
    # keeping the elementwise phase lane-dense.  Each output element gets
    # exactly one nonzero contribution, so this is an exact broadcast.
    a = (jnp.dot(a_h, bh_mat_ref[...], preferred_element_type=jnp.float32) *
         jnp.dot(a_w, bw_mat_ref[...], preferred_element_type=jnp.float32))

    # out = identity * a_w * a_h, in the identity's dtype.
    out_ref[...] = (x * a.astype(x.dtype)).astype(out_ref.dtype)


def coord_att(x, params, *, target_block_bytes=4 << 20):
    N, C, H, W = x.shape
    HW = H * W
    f32 = jnp.float32

    # ---- batch tiling: pack nb images per grid step (~MiB-scale blocks) ----
    per_image = C * HW * x.dtype.itemsize
    nb = 1
    for d in range(1, N + 1):
        if N % d != 0:
            continue
        ok_shape = (d == N) or ((d * C) % 8 == 0)   # (8,128) sublane rule
        if ok_shape and d * per_image <= target_block_bytes:
            nb = d
    if nb == 1 and N > 1 and (C % 8 != 0):
        nb = N          # fall back to a full-extent block (always legal)
    rows = nb * C

    # ---- fold BatchNorm (inference) into conv1 ----
    w1f = params["scale"] * params["w1"]                     # (mip, C)
    b1f = params["scale"] * params["b1"] + params["shift"]   # (mip, 1)

    # ---- block-diagonal weights: a batch of nb images == one 2-D matmul ----
    eye = jnp.eye(nb, dtype=f32)
    w1_bd = jnp.kron(eye, w1f.astype(f32))                   # (nb*mip, nb*C)
    wh_bd = jnp.kron(eye, params["wh"].astype(f32))          # (nb*C, nb*mip)
    ww_bd = jnp.kron(eye, params["ww"].astype(f32))          # (nb*C, nb*mip)
    b1_t = jnp.tile(b1f.astype(f32), (nb, 1))                # (nb*mip, 1)
    bh_t = jnp.tile(params["bh"].astype(f32), (nb, 1))       # (nb*C, 1)
    bw_t = jnp.tile(params["bw"].astype(f32), (nb, 1))       # (nb*C, 1)

    # ---- constant pooling / broadcast matrices over the flattened spatial ----
    hw_idx = jnp.arange(HW)
    h_of = hw_idx // W
    w_of = hw_idx % W
    k_idx = jnp.arange(H + W)
    pool = ((k_idx[None, :] == h_of[:, None]).astype(f32) * (1.0 / W) +
            (k_idx[None, :] == (H + w_of)[:, None]).astype(f32) * (1.0 / H))
    bh_mat = (k_idx[:, None] == h_of[None, :]).astype(f32)   # (H+W, HW)
    bw_mat = (k_idx[:, None] == (H + w_of)[None, :]).astype(f32)  # (H+W, HW)

    # ---- flatten spatial onto lanes (free reshape: NCHW is contiguous) ----
    x2 = x.reshape(N * C, HW)

    def full_spec(a):
        return pl.BlockSpec(a.shape, lambda i: (0,) * a.ndim)

    consts = (pool, bh_mat, bw_mat, w1_bd, b1_t, wh_bd, bh_t, ww_bd, bw_t)
    in_specs = [pl.BlockSpec((rows, HW), lambda i: (i, 0))]
    in_specs += [full_spec(a) for a in consts]

    out2 = pl.pallas_call(
        _coord_att_kernel,
        out_shape=jax.ShapeDtypeStruct((N * C, HW), x.dtype),
        grid=(N // nb,),
        in_specs=in_specs,
        out_specs=pl.BlockSpec((rows, HW), lambda i: (i, 0)),
        compiler_params=pltpu.CompilerParams(
            dimension_semantics=("parallel",),
            vmem_limit_bytes=64 * 1024 * 1024,
        ),
    )(x2, *consts)
    return out2.reshape(N, C, H, W)


def coord_att_ref(x, p):
    """Pure-JAX reference (mirrors the PyTorch forward, BN in eval mode)."""
    x_h = jnp.mean(x, axis=3)                          # (N, C, H)
    x_w = jnp.mean(x, axis=2)                          # (N, C, W)

    def conv1x1(w, b, v):                              # v: (N, Cin, L)
        return jnp.einsum("oc,ncl->nol", w, v) + b[None, :, :]

    def hswish(v):
        return v * jnp.clip(v + 3.0, 0.0, 6.0) / 6.0

    y_h = conv1x1(p["w1"], p["b1"], x_h) * p["scale"][None] + p["shift"][None]
    y_w = conv1x1(p["w1"], p["b1"], x_w) * p["scale"][None] + p["shift"][None]
    y_h = hswish(y_h)
    y_w = hswish(y_w)
    a_h = jax.nn.sigmoid(conv1x1(p["wh"], p["bh"], y_h))   # (N, C, H)
    a_w = jax.nn.sigmoid(conv1x1(p["ww"], p["bw"], y_w))   # (N, C, W)
    return x * a_h[:, :, :, None] * a_w[:, :, None, :]


if __name__ == "__main__":
    key = jax.random.PRNGKey(0)
    N, C, H, W = 2, 4, 16, 16
    reduction = 32
    mip = max(8, C // reduction)

    ks = jax.random.split(key, 12)
    x = jax.random.normal(ks[0], (N, C, H, W), jnp.float32)

    # Deterministic synthetic parameters (shapes from CoordAtt.__init__).
    w1 = jax.random.normal(ks[1], (mip, C), jnp.float32) * 0.5
    b1 = jax.random.normal(ks[2], (mip, 1), jnp.float32) * 0.1
    gamma = 1.0 + 0.1 * jax.random.normal(ks[3], (mip, 1), jnp.float32)
    beta = 0.1 * jax.random.normal(ks[4], (mip, 1), jnp.float32)
    rmean = 0.1 * jax.random.normal(ks[5], (mip, 1), jnp.float32)
    rvar = jax.random.uniform(ks[6], (mip, 1), jnp.float32, minval=0.5, maxval=1.5)
    wh = jax.random.normal(ks[7], (C, mip), jnp.float32) * 0.5
    bh = 0.1 * jax.random.normal(ks[8], (C, 1), jnp.float32)
    ww = jax.random.normal(ks[9], (C, mip), jnp.float32) * 0.5
    bw = 0.1 * jax.random.normal(ks[10], (C, 1), jnp.float32)

    eps = 1e-5
    scale = gamma / jnp.sqrt(rvar + eps)
    shift = beta - rmean * scale

    params = dict(w1=w1, b1=b1, scale=scale, shift=shift,
                  wh=wh, bh=bh, ww=ww, bw=bw)

    out = coord_att(x, params)
    jax.block_until_ready(out)

    ref = coord_att_ref(x, params)
    max_err = float(jnp.max(jnp.abs(out - ref)))
    assert out.shape == (N, C, H, W)
    assert jnp.allclose(out, ref, rtol=1e-4, atol=1e-5), f"max_err={max_err}"
    print("KERNEL_OK")
</pallas_src>

<mosaic_0001>
module attributes {stable_mosaic.version = 11 : i64} {
  func.func @_coord_att_kernel(%arg0: i32, %arg1: memref<8x256xf32, #tpu.memory_space<vmem>>, %arg2: memref<256x32xf32, #tpu.memory_space<vmem>>, %arg3: memref<32x256xf32, #tpu.memory_space<vmem>>, %arg4: memref<32x256xf32, #tpu.memory_space<vmem>>, %arg5: memref<16x8xf32, #tpu.memory_space<vmem>>, %arg6: memref<16x1xf32, #tpu.memory_space<vmem>>, %arg7: memref<8x16xf32, #tpu.memory_space<vmem>>, %arg8: memref<8x1xf32, #tpu.memory_space<vmem>>, %arg9: memref<8x16xf32, #tpu.memory_space<vmem>>, %arg10: memref<8x1xf32, #tpu.memory_space<vmem>>, %arg11: memref<8x256xf32, #tpu.memory_space<vmem>>) attributes {dimension_semantics = [#tpu.dimension_semantics<parallel>], iteration_bounds = array<i64: 1>, scalar_prefetch = 0 : i64, scratch_operands = 0 : i64, tpu.core_type = #tpu.core_type<tc>, window_params = [{transform_indices = @transform_0, window_bounds = array<i64: 8, 256>}, {pipeline_mode = #tpu.pipeline_mode<synchronous>, transform_indices = @transform_1, window_bounds = array<i64: 256, 32>}, {pipeline_mode = #tpu.pipeline_mode<synchronous>, transform_indices = @transform_2, window_bounds = array<i64: 32, 256>}, {pipeline_mode = #tpu.pipeline_mode<synchronous>, transform_indices = @transform_3, window_bounds = array<i64: 32, 256>}, {pipeline_mode = #tpu.pipeline_mode<synchronous>, transform_indices = @transform_4, window_bounds = array<i64: 16, 8>}, {pipeline_mode = #tpu.pipeline_mode<synchronous>, transform_indices = @transform_5, window_bounds = array<i64: 16, 1>}, {pipeline_mode = #tpu.pipeline_mode<synchronous>, transform_indices = @transform_6, window_bounds = array<i64: 8, 16>}, {pipeline_mode = #tpu.pipeline_mode<synchronous>, transform_indices = @transform_7, window_bounds = array<i64: 8, 1>}, {pipeline_mode = #tpu.pipeline_mode<synchronous>, transform_indices = @transform_8, window_bounds = array<i64: 8, 16>}, {pipeline_mode = #tpu.pipeline_mode<synchronous>, transform_indices = @transform_9, window_bounds = array<i64: 8, 1>}, {transform_indices = @transform_10, window_bounds = array<i64: 8, 256>}]} {
    %c0 = arith.constant 0 : index
    %c0_0 = arith.constant 0 : index
    %0 = vector.load %arg1[%c0, %c0_0] : memref<8x256xf32, #tpu.memory_space<vmem>>, vector<8x256xf32>
    %c0_1 = arith.constant 0 : index
    %c0_2 = arith.constant 0 : index
    %1 = vector.load %arg2[%c0_1, %c0_2] : memref<256x32xf32, #tpu.memory_space<vmem>>, vector<256x32xf32>
    %cst = arith.constant dense<0.000000e+00> : vector<8x32xf32>
    %2 = tpu.matmul %0, %1, %cst {dimension_numbers = #tpu.dot_dimension_numbers<[1], [0], [0], [1], [0, 0, 1, 1], [], []>} : vector<8x256xf32>, vector<256x32xf32>, vector<8x32xf32> -> vector<8x32xf32>
    %c0_3 = arith.constant 0 : index
    %c0_4 = arith.constant 0 : index
    %3 = vector.load %arg5[%c0_3, %c0_4] : memref<16x8xf32, #tpu.memory_space<vmem>>, vector<16x8xf32>
    %cst_5 = arith.constant dense<0.000000e+00> : vector<16x32xf32>
    %4 = tpu.matmul %3, %2, %cst_5 {dimension_numbers = #tpu.dot_dimension_numbers<[1], [0], [0], [1], [0, 0, 1, 1], [], []>} : vector<16x8xf32>, vector<8x32xf32>, vector<16x32xf32> -> vector<16x32xf32>
    %c0_6 = arith.constant 0 : index
    %c0_7 = arith.constant 0 : index
    %5 = vector.load %arg6[%c0_6, %c0_7] : memref<16x1xf32, #tpu.memory_space<vmem>>, vector<16x1xf32>
    %6 = vector.broadcast %5 : vector<16x1xf32> to vector<16x32xf32>
    %7 = arith.addf %4, %6 : vector<16x32xf32>
    %cst_8 = arith.constant 3.000000e+00 : f32
    %8 = vector.broadcast %cst_8 : f32 to vector<16x32xf32>
    %9 = arith.addf %7, %8 : vector<16x32xf32>
    %cst_9 = arith.constant 0.000000e+00 : f32
    %cst_10 = arith.constant 6.000000e+00 : f32
    %10 = vector.broadcast %cst_9 : f32 to vector<16x32xf32>
    %11 = arith.maximumf %10, %9 : vector<16x32xf32>
    %12 = vector.broadcast %cst_10 : f32 to vector<16x32xf32>
    %13 = arith.minimumf %12, %11 : vector<16x32xf32>
    %cst_11 = arith.constant 0.166666672 : f32
    %14 = vector.broadcast %cst_11 : f32 to vector<16x32xf32>
    %15 = arith.mulf %13, %14 : vector<16x32xf32>
    %16 = arith.mulf %7, %15 : vector<16x32xf32>
    %c0_12 = arith.constant 0 : index
    %c0_13 = arith.constant 0 : index
    %17 = vector.load %arg7[%c0_12, %c0_13] : memref<8x16xf32, #tpu.memory_space<vmem>>, vector<8x16xf32>
    %cst_14 = arith.constant dense<0.000000e+00> : vector<8x32xf32>
    %18 = tpu.matmul %17, %16, %cst_14 {dimension_numbers = #tpu.dot_dimension_numbers<[1], [0], [0], [1], [0, 0, 1, 1], [], []>} : vector<8x16xf32>, vector<16x32xf32>, vector<8x32xf32> -> vector<8x32xf32>
    %c0_15 = arith.constant 0 : index
    %c0_16 = arith.constant 0 : index
    %19 = vector.load %arg8[%c0_15, %c0_16] : memref<8x1xf32, #tpu.memory_space<vmem>>, vector<8x1xf32>
    %20 = vector.broadcast %19 : vector<8x1xf32> to vector<8x32xf32>
    %21 = arith.addf %18, %20 : vector<8x32xf32>
    %22 = arith.negf %21 : vector<8x32xf32>
    %23 = math.exp %22 : vector<8x32xf32>
    %cst_17 = arith.constant 1.000000e+00 : f32
    %24 = vector.broadcast %cst_17 : f32 to vector<8x32xf32>
    %25 = arith.addf %24, %23 : vector<8x32xf32>
    %26 = arith.divf %24, %25 : vector<8x32xf32>
    %c0_18 = arith.constant 0 : index
    %c0_19 = arith.constant 0 : index
    %27 = vector.load %arg9[%c0_18, %c0_19] : memref<8x16xf32, #tpu.memory_space<vmem>>, vector<8x16xf32>
    %cst_20 = arith.constant dense<0.000000e+00> : vector<8x32xf32>
    %28 = tpu.matmul %27, %16, %cst_20 {dimension_numbers = #tpu.dot_dimension_numbers<[1], [0], [0], [1], [0, 0, 1, 1], [], []>} : vector<8x16xf32>, vector<16x32xf32>, vector<8x32xf32> -> vector<8x32xf32>
    %c0_21 = arith.constant 0 : index
    %c0_22 = arith.constant 0 : index
    %29 = vector.load %arg10[%c0_21, %c0_22] : memref<8x1xf32, #tpu.memory_space<vmem>>, vector<8x1xf32>
    %30 = vector.broadcast %29 : vector<8x1xf32> to vector<8x32xf32>
    %31 = arith.addf %28, %30 : vector<8x32xf32>
    %32 = arith.negf %31 : vector<8x32xf32>
    %33 = math.exp %32 : vector<8x32xf32>
    %cst_23 = arith.constant 1.000000e+00 : f32
    %34 = vector.broadcast %cst_23 : f32 to vector<8x32xf32>
    %35 = arith.addf %34, %33 : vector<8x32xf32>
    %36 = arith.divf %34, %35 : vector<8x32xf32>
    %c0_24 = arith.constant 0 : index
    %c0_25 = arith.constant 0 : index
    %37 = vector.load %arg3[%c0_24, %c0_25] : memref<32x256xf32, #tpu.memory_space<vmem>>, vector<32x256xf32>
    %cst_26 = arith.constant dense<0.000000e+00> : vector<8x256xf32>
    %38 = tpu.matmul %26, %37, %cst_26 {dimension_numbers = #tpu.dot_dimension_numbers<[1], [0], [0], [1], [0, 0, 1, 1], [], []>} : vector<8x32xf32>, vector<32x256xf32>, vector<8x256xf32> -> vector<8x256xf32>
    %c0_27 = arith.constant 0 : index
    %c0_28 = arith.constant 0 : index
    %39 = vector.load %arg4[%c0_27, %c0_28] : memref<32x256xf32, #tpu.memory_space<vmem>>, vector<32x256xf32>
    %cst_29 = arith.constant dense<0.000000e+00> : vector<8x256xf32>
    %40 = tpu.matmul %36, %39, %cst_29 {dimension_numbers = #tpu.dot_dimension_numbers<[1], [0], [0], [1], [0, 0, 1, 1], [], []>} : vector<8x32xf32>, vector<32x256xf32>, vector<8x256xf32> -> vector<8x256xf32>
    %41 = arith.mulf %38, %40 : vector<8x256xf32>
    %42 = arith.mulf %0, %41 : vector<8x256xf32>
    %c0_30 = arith.constant 0 : index
    %c0_31 = arith.constant 0 : index
    %43 = vector.load %arg11[%c0_30, %c0_31] : memref<8x256xf32, #tpu.memory_space<vmem>>, vector<8x256xf32>
    tpu.vector_store %arg11[%c0_30, %c0_31], %42 {strides = array<i32>} : memref<8x256xf32, #tpu.memory_space<vmem>>, vector<8x256xf32>,
    return
  }
  func.func @transform_0(%arg0: i32) -> (i32, i32) {
    %c0_i32 = arith.constant 0 : i32
    %c0_i32_0 = arith.constant 0 : i32
    return %arg0, %c0_i32 : i32, i32
  }
  func.func @transform_1(%arg0: i32) -> (i32, i32) {
    %c0_i32 = arith.constant 0 : i32
    %c0_i32_0 = arith.constant 0 : i32
    %c0_i32_1 = arith.constant 0 : i32
    return %c0_i32, %c0_i32_0 : i32, i32
  }
  func.func @transform_2(%arg0: i32) -> (i32, i32) {
    %c0_i32 = arith.constant 0 : i32
    %c0_i32_0 = arith.constant 0 : i32
    %c0_i32_1 = arith.constant 0 : i32
    return %c0_i32, %c0_i32_0 : i32, i32
  }
  func.func @transform_3(%arg0: i32) -> (i32, i32) {
    %c0_i32 = arith.constant 0 : i32
    %c0_i32_0 = arith.constant 0 : i32
    %c0_i32_1 = arith.constant 0 : i32
    return %c0_i32, %c0_i32_0 : i32, i32
  }
  func.func @transform_4(%arg0: i32) -> (i32, i32) {
    %c0_i32 = arith.constant 0 : i32
    %c0_i32_0 = arith.constant 0 : i32
    %c0_i32_1 = arith.constant 0 : i32
    return %c0_i32, %c0_i32_0 : i32, i32
  }
  func.func @transform_5(%arg0: i32) -> (i32, i32) {
    %c0_i32 = arith.constant 0 : i32
    %c0_i32_0 = arith.constant 0 : i32
    %c0_i32_1 = arith.constant 0 : i32
    return %c0_i32, %c0_i32_0 : i32, i32
  }
  func.func @transform_6(%arg0: i32) -> (i32, i32) {
    %c0_i32 = arith.constant 0 : i32
    %c0_i32_0 = arith.constant 0 : i32
    %c0_i32_1 = arith.constant 0 : i32
    return %c0_i32, %c0_i32_0 : i32, i32
  }
  func.func @transform_7(%arg0: i32) -> (i32, i32) {
    %c0_i32 = arith.constant 0 : i32
    %c0_i32_0 = arith.constant 0 : i32
    %c0_i32_1 = arith.constant 0 : i32
    return %c0_i32, %c0_i32_0 : i32, i32
  }
  func.func @transform_8(%arg0: i32) -> (i32, i32) {
    %c0_i32 = arith.constant 0 : i32
    %c0_i32_0 = arith.constant 0 : i32
    %c0_i32_1 = arith.constant 0 : i32
    return %c0_i32, %c0_i32_0 : i32, i32
  }
  func.func @transform_9(%arg0: i32) -> (i32, i32) {
    %c0_i32 = arith.constant 0 : i32
    %c0_i32_0 = arith.constant 0 : i32
    %c0_i32_1 = arith.constant 0 : i32
    return %c0_i32, %c0_i32_0 : i32, i32
  }
  func.func @transform_10(%arg0: i32) -> (i32, i32) {
    %c0_i32 = arith.constant 0 : i32
    %c0_i32_0 = arith.constant 0 : i32
    return %arg0, %c0_i32 : i32, i32
  }
}

</mosaic_0001>

<bundles_post_ra>
// kernel: tpu_custom_call.1
= control target key start
LH: loop header
LB: loop body
LE: loop exit
PB: predicated region body
PF: predicated region fallthrough
CT: control target
= control target key end

     0   :  { %15 = vsyncpa [#allocation3], 0  ;;  %s1381_s0 = inlined_call_operand.hbm [shape: f32[8,256], index: 0, kind: input, shape index: {}]   ;;  %s1382_s1 = inlined_call_operand.hbm [shape: f32[256,32], index: 1, kind: input, shape index: {}]   ;;  %s1383_s2 = inlined_call_operand.hbm [shape: f32[32,256], index: 2, kind: input, shape index: {}]   ;;  %s1384_s3 = inlined_call_operand.hbm [shape: f32[32,256], index: 3, kind: input, shape index: {}]   ;;  %s1385_s4 = inlined_call_operand.hbm [shape: f32[16,8], index: 4, kind: input, shape index: {}]   ;;  %s1386_s5 = inlined_call_operand.hbm [shape: f32[16,1], index: 5, kind: input, shape index: {}]   ;;  %s1387_s6 = inlined_call_operand.hbm [shape: f32[8,16], index: 6, kind: input, shape index: {}]   ;;  %s1388_s7 = inlined_call_operand.hbm [shape: f32[8,1], index: 7, kind: input, shape index: {}]   ;;  %s1389_s8 = inlined_call_operand.hbm [shape: f32[8,16], index: 8, kind: input, shape index: {}]   ;;  %s1390_s9 = inlined_call_operand.hbm [shape: f32[8,1], index: 9, kind: input, shape index: {}]   ;;  %s1391_s10 = inlined_call_operand.hbm [shape: f32[8,256], index: 10, kind: output, shape index: {}]  }
   0x1   :  { %16 = vsyncpa [#allocation6], 0 }
   0x2   :  { %17 = vsyncpa [#allocation9], 0 }
   0x3   :  { %18 = vsyncpa [#allocation12], 0 }
   0x4   :  { %19 = vsyncpa [#allocation15], 0 }
   0x5   :  { %20 = vsyncpa [#allocation18], 0 }
   0x6   :  { %21 = vsyncpa [#allocation4], 0  ;;  %s1146_s13 = smov [#allocation5]   ;;  %s890_s17 = scalar_lea.hbm %s1382_s1, 4096 }
   0x7   :  { %s37_s14 = sshll.u32 %s1146_s13, 4  ;;  %p891_p0 = scmp.ne.s32.totalorder %s1382_s1, %s890_s17  ;;  %s38_s14 = int_to_ptr.vmem [resolvable:$true] %s37_s14 }
   0x8   :  { %p894_p1 = scmp.lt.u32.totalorder %s890_s17, %s1382_s1 }
   0xa   :  { %p896_p2 = pnand %p894_p1, %p891_p0 }
   0xc   :  { %899 = shalt.err (!%p896_p2)
}
   0xd   :  { %s900_s22 = scalar_lea.vmem %s38_s14, 4096  ;;  %p905_p4 = scmp.lt.s32.totalorder %s38_s14, %s38_s14 }
   0xe   :  { %p901_p3 = scmp.ne.s32.totalorder %s38_s14, %s900_s22  ;;  %p906_p5 = scmp.lt.s32.totalorder %s900_s22, %s900_s22 }
  0x10   :  { %p907_p6 = por %p906_p5, %p905_p4 }
  0x12   :  { %p908_p7 = pnand %p907_p6, %p901_p3 }
  0x14   :  { %911 = shalt.err (!%p908_p7)
}
  0x15   :  { %s1147_s23 = smov 128   ;;  %s1148_s24 = smov 8  }
  0x16   :  { %43 = dma.hbm_to_vmem [thread:$0]  %s1382_s1, 4096, %s38_s14, [#allocation6], %s1147_s23, %s1147_s23, %s1148_s24  }
  0x17   :  { %s1149_s27 = smov [#allocation8]   ;;  %s1150_s29 = smov [#allocation11]  }
  0x18   :  { %s61_s28 = sshll.u32 %s1149_s27, 4  ;;  %s85_s30 = sshll.u32 %s1150_s29, 4  ;;  %s62_s28 = int_to_ptr.vmem [resolvable:$true] %s61_s28  ;;  %s86_s30 = int_to_ptr.vmem [resolvable:$true] %s85_s30 }
  0x19   :  { %s912_s13 = scalar_lea.hbm %s1384_s3, 1024 }
  0x1a   :  { %p913_p8 = scmp.ne.s32.totalorder %s1384_s3, %s912_s13  ;;  %p916_p9 = scmp.lt.u32.totalorder %s912_s13, %s1384_s3 }
  0x1c   :  { %p918_p10 = pnand %p916_p9, %p913_p8 }
  0x1e   :  { %921 = shalt.err (!%p918_p10)
}
  0x1f   :  { %s922_s1 = scalar_lea.vmem %s62_s28, 1024  ;;  %p927_p12 = scmp.lt.s32.totalorder %s62_s28, %s62_s28 }
  0x20   :  { %p923_p11 = scmp.ne.s32.totalorder %s62_s28, %s922_s1  ;;  %p928_p13 = scmp.lt.s32.totalorder %s922_s1, %s922_s1 }
  0x22   :  { %p929_p0 = por %p928_p13, %p927_p12 }
  0x24   :  { %p930_p1 = pnand %p929_p0, %p923_p11 }
  0x26   :  { %933 = shalt.err (!%p930_p1)
}
  0x27   :  { %s1151_s14 = smov 256   ;;  %s1152_s19 = smov 16  }
  0x28   :  { %67 = dma.hbm_to_vmem [thread:$0]  %s1384_s3, 1024, %s62_s28, [#allocation9], %s1151_s14, %s1151_s14, %s1152_s19  }
  0x29   :  { %s934_s26 = scalar_lea.hbm %s1386_s5, 256 }
  0x2a   :  { %p935_p2 = scmp.ne.s32.totalorder %s1386_s5, %s934_s26  ;;  %p938_p3 = scmp.lt.u32.totalorder %s934_s26, %s1386_s5 }
  0x2c   :  { %p940_p4 = pnand %p938_p3, %p935_p2 }
  0x2e   :  { %943 = shalt.err (!%p940_p4)
}
  0x2f   :  { %s944_s13 = scalar_lea.vmem %s86_s30, 256  ;;  %p949_p6 = scmp.lt.s32.totalorder %s86_s30, %s86_s30 }
  0x30   :  { %p945_p5 = scmp.ne.s32.totalorder %s86_s30, %s944_s13  ;;  %p950_p7 = scmp.lt.s32.totalorder %s944_s13, %s944_s13 }
  0x32   :  { %p951_p8 = por %p950_p7, %p949_p6 }
  0x34   :  { %p952_p9 = pnand %p951_p8, %p945_p5 }
  0x36   :  { %955 = shalt.err (!%p952_p9)
}
  0x37   :  { %91 = dma.hbm_to_vmem [thread:$0]  %s1386_s5, 256, %s86_s30, [#allocation12], %s1147_s23, %s1147_s23, %s1148_s24  }
  0x38   :  { %s1153_s15 = smov [#allocation14]   ;;  %s1154_s17 = smov [#allocation2]  }
  0x39   :  { %s108_s16 = sshll.u32 %s1153_s15, 4  ;;  %s28_s18 = sshll.u32 %s1154_s17, 4  ;;  %s109_s16 = int_to_ptr.vmem [resolvable:$true] %s108_s16  ;;  %s29_s18 = int_to_ptr.vmem [resolvable:$true] %s28_s18 }
  0x3a   :  { %s956_s21 = scalar_lea.hbm %s1388_s7, 128 }
  0x3b   :  { %p957_p10 = scmp.ne.s32.totalorder %s1388_s7, %s956_s21  ;;  %p960_p11 = scmp.lt.u32.totalorder %s956_s21, %s1388_s7 }
  0x3d   :  { %p962_p12 = pnand %p960_p11, %p957_p10 }
  0x3f   :  { %965 = shalt.err (!%p962_p12)
}
  0x40   :  { %s966_s5 = scalar_lea.vmem %s109_s16, 128  ;;  %p971_p0 = scmp.lt.s32.totalorder %s109_s16, %s109_s16 }
  0x41   :  { %p967_p13 = scmp.ne.s32.totalorder %s109_s16, %s966_s5  ;;  %p972_p1 = scmp.lt.s32.totalorder %s966_s5, %s966_s5 }
  0x43   :  { %p973_p2 = por %p972_p1, %p971_p0 }
  0x45   :  { %p974_p3 = pnand %p973_p2, %p967_p13 }
  0x47   :  { %977 = shalt.err (!%p974_p3)
}
  0x48   :  { %111 = dma.hbm_to_vmem [thread:$0]  %s1388_s7, 128, %s109_s16, [#allocation15]  }
  0x49   :  { %s978_s13 = scalar_lea.hbm %s1381_s0, 256 }
  0x4a   :  { %p979_p4 = scmp.ne.s32.totalorder %s1381_s0, %s978_s13  ;;  %p982_p5 = scmp.lt.u32.totalorder %s978_s13, %s1381_s0 }
  0x4c   :  { %p984_p6 = pnand %p982_p5, %p979_p4 }
  0x4e   :  { %987 = shalt.err (!%p984_p6)
}
  0x4f   :  { %s988_s1 = scalar_lea.vmem %s29_s18, 256  ;;  %p993_p8 = scmp.lt.s32.totalorder %s29_s18, %s29_s18 }
  0x50   :  { %p989_p7 = scmp.ne.s32.totalorder %s29_s18, %s988_s1  ;;  %p994_p9 = scmp.lt.s32.totalorder %s988_s1, %s988_s1 }
  0x52   :  { %p995_p10 = por %p994_p9, %p993_p8 }
  0x54   :  { %p996_p11 = pnand %p995_p10, %p989_p7 }
  0x56   :  { %999 = shalt.err (!%p996_p11)
}
  0x57   :  { %31 = dma.hbm_to_vmem [thread:$0]  %s1381_s0, 256, %s29_s18, [#allocation3]  }
  0x58   :  { %s1155_s20 = smov [#allocation7]   ;;  %s1156_s22 = smov [#allocation10]  }
  0x59   :  { %s49_s21 = sshll.u32 %s1155_s20, 4  ;;  %s73_s25 = sshll.u32 %s1156_s22, 4  ;;  %s50_s21 = int_to_ptr.vmem [resolvable:$true] %s49_s21  ;;  %s74_s25 = int_to_ptr.vmem [resolvable:$true] %s73_s25 }
  0x5a   :  { %s1000_s5 = scalar_lea.hbm %s1383_s2, 1024 }
  0x5b   :  { %p1001_p12 = scmp.ne.s32.totalorder %s1383_s2, %s1000_s5  ;;  %p1004_p13 = scmp.lt.u32.totalorder %s1000_s5, %s1383_s2 }
  0x5d   :  { %p1006_p0 = pnand %p1004_p13, %p1001_p12 }
  0x5f   :  { %1009 = shalt.err (!%p1006_p0)
}
  0x60   :  { %s1010_s0 = scalar_lea.vmem %s50_s21, 1024  ;;  %p1015_p2 = scmp.lt.s32.totalorder %s50_s21, %s50_s21 }
  0x61   :  { %p1011_p1 = scmp.ne.s32.totalorder %s50_s21, %s1010_s0  ;;  %p1016_p3 = scmp.lt.s32.totalorder %s1010_s0, %s1010_s0 }
  0x63   :  { %p1017_p4 = por %p1016_p3, %p1015_p2 }
  0x65   :  { %p1018_p5 = pnand %p1017_p4, %p1011_p1 }
  0x67   :  { %1021 = shalt.err (!%p1018_p5)
}
  0x68   :  { %55 = dma.hbm_to_vmem [thread:$0]  %s1383_s2, 1024, %s50_s21, [#allocation6], %s1151_s14, %s1151_s14, %s1152_s19  }
  0x69   :  { %s1022_s15 = scalar_lea.hbm %s1385_s4, 256 }
  0x6a   :  { %p1023_p6 = scmp.ne.s32.totalorder %s1385_s4, %s1022_s15  ;;  %p1026_p7 = scmp.lt.u32.totalorder %s1022_s15, %s1385_s4 }
  0x6c   :  { %p1028_p8 = pnand %p1026_p7, %p1023_p6 }
  0x6e   :  { %1031 = shalt.err (!%p1028_p8)
}
  0x6f   :  { %s1032_s20 = scalar_lea.vmem %s74_s25, 256  ;;  %p1037_p10 = scmp.lt.s32.totalorder %s74_s25, %s74_s25 }
  0x70   :  { %p1033_p9 = scmp.ne.s32.totalorder %s74_s25, %s1032_s20  ;;  %p1038_p11 = scmp.lt.s32.totalorder %s1032_s20, %s1032_s20 }
  0x72   :  { %p1039_p12 = por %p1038_p11, %p1037_p10 }
  0x74   :  { %p1040_p13 = pnand %p1039_p12, %p1033_p9 }
  0x76   :  { %1043 = shalt.err (!%p1040_p13)
}
  0x77   :  { %79 = dma.hbm_to_vmem [thread:$0]  %s1385_s4, 256, %s74_s25, [#allocation9], %s1147_s23, %s1147_s23, %s1148_s24  }
  0x78   :  { %s1157_s19 = smov [#allocation13]   ;;  %s1158_s22 = smov [#allocation16]  }
  0x79   :  { %s98_s21 = sshll.u32 %s1157_s19, 4  ;;  %s118_s26 = sshll.u32 %s1158_s22, 4  ;;  %s99_s21 = int_to_ptr.vmem [resolvable:$true] %s98_s21  ;;  %s119_s26 = int_to_ptr.vmem [resolvable:$true] %s118_s26 }
  0x7a   :  { %s1044_s30 = scalar_lea.hbm %s1387_s6, 128 }
  0x7b   :  { %p1045_p0 = scmp.ne.s32.totalorder %s1387_s6, %s1044_s30  ;;  %p1048_p1 = scmp.lt.u32.totalorder %s1044_s30, %s1387_s6 }
  0x7d   :  { %p1050_p2 = pnand %p1048_p1, %p1045_p0 }
  0x7f   :  { %1053 = shalt.err (!%p1050_p2)
}
  0x80   :  { %s1054_s4 = scalar_lea.vmem %s99_s21, 128  ;;  %p1059_p4 = scmp.lt.s32.totalorder %s99_s21, %s99_s21 }
  0x81   :  { %p1055_p3 = scmp.ne.s32.totalorder %s99_s21, %s1054_s4  ;;  %p1060_p5 = scmp.lt.s32.totalorder %s1054_s4, %s1054_s4 }
  0x83   :  { %p1061_p6 = por %p1060_p5, %p1059_p4 }
  0x85   :  { %p1062_p7 = pnand %p1061_p6, %p1055_p3 }
  0x87   :  { %1065 = shalt.err (!%p1062_p7)
}
  0x88   :  { %101 = dma.hbm_to_vmem [thread:$0]  %s1387_s6, 128, %s99_s21, [#allocation12]  }
  0x89   :  { %s1066_s13 = scalar_lea.hbm %s1389_s8, 128 }
  0x8a   :  { %p1067_p8 = scmp.ne.s32.totalorder %s1389_s8, %s1066_s13  ;;  %p1070_p9 = scmp.lt.u32.totalorder %s1066_s13, %s1389_s8 }
  0x8c   :  { %p1072_p10 = pnand %p1070_p9, %p1067_p8 }
  0x8e   :  { %1075 = shalt.err (!%p1072_p10)
}
  0x8f   :  { %s1076_s1 = scalar_lea.vmem %s119_s26, 128  ;;  %p1081_p12 = scmp.lt.s32.totalorder %s119_s26, %s119_s26 }
  0x90   :  { %p1077_p11 = scmp.ne.s32.totalorder %s119_s26, %s1076_s1  ;;  %p1082_p13 = scmp.lt.s32.totalorder %s1076_s1, %s1076_s1 }
  0x92   :  { %p1083_p0 = por %p1082_p13, %p1081_p12 }
  0x94   :  { %p1084_p1 = pnand %p1083_p0, %p1077_p11 }
  0x96   :  { %1087 = shalt.err (!%p1084_p1)
}
  0x97   :  { %121 = dma.hbm_to_vmem [thread:$0]  %s1389_s8, 128, %s119_s26, [#allocation15]  }
  0x98   :  { %s1159_s16 = smov [#allocation17]   ;;  %s1088_s19 = scalar_lea.hbm %s1390_s9, 128 }
  0x99   :  { %s128_s20 = sshll.u32 %s1159_s16, 4  ;;  %p1089_p2 = scmp.ne.s32.totalorder %s1390_s9, %s1088_s19  ;;  %s129_s20 = int_to_ptr.vmem [resolvable:$true] %s128_s20 }
  0x9a   :  { %p1092_p3 = scmp.lt.u32.totalorder %s1088_s19, %s1390_s9 }
  0x9c   :  { %p1094_p4 = pnand %p1092_p3, %p1089_p2 }
  0x9e   :  { %1097 = shalt.err (!%p1094_p4)
}
  0x9f   :  { %s1098_s30 = scalar_lea.vmem %s129_s20, 128  ;;  %p1103_p6 = scmp.lt.s32.totalorder %s129_s20, %s129_s20 }
  0xa0   :  { %p1099_p5 = scmp.ne.s32.totalorder %s129_s20, %s1098_s30  ;;  %p1104_p7 = scmp.lt.s32.totalorder %s1098_s30, %s1098_s30 }
  0xa2   :  { %p1105_p8 = por %p1104_p7, %p1103_p6 }
  0xa4   :  { %p1106_p9 = pnand %p1105_p8, %p1099_p5 }
  0xa6   :  { %1109 = shalt.err (!%p1106_p9)
}
  0xa7   :  { %131 = dma.hbm_to_vmem [thread:$0]  %s1390_s9, 128, %s129_s20, [#allocation18]  }
  0xa8   :  { %1132 = dma.done.wait [#allocation3], 256  }
  0xa9   :  { %1133 = vsyncadd [#allocation3], 4294967040 }
  0xaa   :  { %1134 = dma.done.wait [#allocation6], 5120  }
  0xab   :  { %1135 = vsyncadd [#allocation6], 4294962176 }
  0xac   :  { %1136 = dma.done.wait [#allocation9], 1280  }
  0xad   :  { %1137 = vsyncadd [#allocation9], 4294966016 }
  0xae   :  { %1138 = dma.done.wait [#allocation12], 384  }
  0xaf   :  { %1139 = vsyncadd [#allocation12], 4294966912 }
  0xb0   :  { %1140 = dma.done.wait [#allocation15], 256  }
  0xb1   :  { %1141 = vsyncadd [#allocation15], 4294967040 }
  0xb2   :  { %1142 = dma.done.wait [#allocation18], 128  }
  0xb3   :  { %1143 = vsyncadd [#allocation18], 4294967168  ;;  %v180_v0 = vld [vmem:[#allocation5 + $0x80] sm:$0xff]  ;;  %v181_v1 = vld [vmem:[#allocation5 + $0x88] sm:$0xff]  ;;  %vm280_vm0 = vcmask 64512   ;;  %v1160_v52 = vmov 0  }
  0xb4   :  { %v164_v2 = vld [vmem:[#allocation5] sm:$0xff]  ;;  %v807_v3 = vpack.c.bf16 %v181_v1, %v180_v0  ;;  %v165_v4 = vld [vmem:[#allocation5 + $0x8] sm:$0xff]  ;;  %v182_v5 = vld [vmem:[#allocation5 + $0x90] sm:$0xff]  ;;  %880 = vset.pattern.permute.xlu0 %v1160_v52  ;;  %881 = vset.pattern.permute.xlu1 %v1160_v52  ;;  %v1161_v58 = vmov 0.0|0.0   ;;  %vm1162_vm1 = vmmov 0   ;;  %v1163_v59 = vmov 0.0  }
  0xb5   :  { %v183_v6 = vld [vmem:[#allocation5 + $0x98] sm:$0xff]  ;;  %v809_v7 = vpack.c.bf16 %v165_v4, %v164_v2  ;;  %v166_v9 = vld [vmem:[#allocation5 + $0x10] sm:$0xff]  ;;  %v184_v11 = vld [vmem:[#allocation5 + $0xa0] sm:$0xff]  ;;  %vm379_vm2 = vcmask 130048   ;;  %vm553_vm3 = vcmask 261120   ;;  %s1164_s9 = smov [#allocation19]  }
  0xb6   :  { %v811_v8 = vpack.c.bf16 %v183_v6, %v182_v5  ;;  %v167_v10 = vld [vmem:[#allocation5 + $0x18] sm:$0xff]  ;;  %808 = vmatprep.subr.bf16.mxu0 %v807_v3  ;;  %v185_v12 = vld [vmem:[#allocation5 + $0xa8] sm:$0xff]  ;;  %v168_v15 = vld [vmem:[#allocation5 + $0x20] sm:$0xff]  ;;  %s722_s29 = sshll.u32 %s1164_s9, 4  ;;  %s723_s29 = int_to_ptr.vmem [resolvable:$true] %s722_s29 }
  0xb7   :  { %810 = vmatpush3.bf16.msra.mxu0 %v809_v7  ;;  %v813_v13 = vpack.c.bf16 %v167_v10, %v166_v9  ;;  %v815_v14 = vpack.c.bf16 %v185_v12, %v184_v11  ;;  %v169_v16 = vld [vmem:[#allocation5 + $0x28] sm:$0xff]  ;;  %v186_v17 = vld [vmem:[#allocation5 + $0xb0] sm:$0xff]  ;;  %v187_v18 = vld [vmem:[#allocation5 + $0xb8] sm:$0xff]  ;;  %s1110_s11 = scalar_lea.vmem %s723_s29, 256  ;;  %p1115_p11 = scmp.lt.s32.totalorder %s723_s29, %s723_s29 }
  0xb8   :  { %812 = vmatprep.subr.bf16.mxu0 %v811_v8  ;;  %v817_v19 = vpack.c.bf16 %v169_v16, %v168_v15  ;;  %v819_v20 = vpack.c.bf16 %v187_v18, %v186_v17  ;;  %v170_v21 = vld [vmem:[#allocation5 + $0x30] sm:$0xff]  ;;  %v171_v22 = vld [vmem:[#allocation5 + $0x38] sm:$0xff]  ;;  %v188_v23 = vld [vmem:[#allocation5 + $0xc0] sm:$0xff]  ;;  %p1111_p10 = scmp.ne.s32.totalorder %s723_s29, %s1110_s11  ;;  %p1116_p12 = scmp.lt.s32.totalorder %s1110_s11, %s1110_s11 }
  0xb9   :  { %v189_v24 = vld [vmem:[#allocation5 + $0xc8] sm:$0xff]  ;;  %v1355_v25 = vld [vmem:[#allocation2 + $0x8] sm:$0xff]  ;;  %v821_v26 = vpack.c.bf16 %v171_v22, %v170_v21  ;;  %v172_v28 = vld [vmem:[#allocation5 + $0x40] sm:$0xff] }
  0xba   :  { %260 = vmatprep.mubr.f32.mxu0 %v1355_v25  ;;  %v823_v27 = vpack.c.bf16 %v189_v24, %v188_v23  ;;  %v173_v29 = vld [vmem:[#allocation5 + $0x48] sm:$0xff]  ;;  %v190_v30 = vld [vmem:[#allocation5 + $0xd0] sm:$0xff]  ;;  %v191_v31 = vld [vmem:[#allocation5 + $0xd8] sm:$0xff]  ;;  %p1117_p13 = por %p1116_p12, %p1115_p11 }
  0xbb   :  { %814 = vmatpush3.bf16.msra.mxu0 %v813_v13  ;;  %v825_v32 = vpack.c.bf16 %v173_v29, %v172_v28  ;;  %v827_v33 = vpack.c.bf16 %v191_v31, %v190_v30  ;;  %v174_v34 = vld [vmem:[#allocation5 + $0x50] sm:$0xff]  ;;  %v175_v35 = vld [vmem:[#allocation5 + $0x58] sm:$0xff]  ;;  %v192_v36 = vld [vmem:[#allocation5 + $0xe0] sm:$0xff] }
  0xbc   :  { %816 = vmatprep.subr.bf16.mxu0 %v815_v14  ;;  %v193_v37 = vld [vmem:[#allocation5 + $0xe8] sm:$0xff]  ;;  %v829_v38 = vpack.c.bf16 %v175_v35, %v174_v34  ;;  %v176_v40 = vld [vmem:[#allocation5 + $0x60] sm:$0xff]  ;;  %v194_v42 = vld [vmem:[#allocation5 + $0xf0] sm:$0xff]  ;;  %p1118_p0 = pnand %p1117_p13, %p1111_p10 }
  0xbd   :  { %v831_v39 = vpack.c.bf16 %v193_v37, %v192_v36  ;;  %v177_v41 = vld [vmem:[#allocation5 + $0x68] sm:$0xff]  ;;  %v195_v43 = vld [vmem:[#allocation5 + $0xf8] sm:$0xff]  ;;  %v178_v46 = vld [vmem:[#allocation5 + $0x70] sm:$0xff] }
  0xbe   :  { %v833_v44 = vpack.c.bf16 %v177_v41, %v176_v40  ;;  %v835_v45 = vpack.c.bf16 %v195_v43, %v194_v42  ;;  %v179_v47 = vld [vmem:[#allocation5 + $0x78] sm:$0xff]  ;;  %v1358_v49 = vld [vmem:[#allocation2] sm:$0xff]  ;;  %v266_v50 = vld [vmem:[#allocation10] sm:$0xff] }
  0xbf   :  { %818 = vmatpush3.bf16.msra.mxu0 %v817_v19  ;;  %v837_v48 = vpack.c.bf16 %v179_v47, %v178_v46  ;;  %790 = vmatprep.mubr.msk.f32.mxu1 %vm280_vm0, %v266_v50  ;;  %v268_v51 = vld [vmem:[#allocation11] sm:$0xff]  ;;  %v269_v53 = vld [vmem:[#allocation11 + $0x8] sm:$0xff]  ;;  %v267_v57 = vld [vmem:[#allocation10 + $0x8] sm:$0xff] }
  0xc0   :  { %820 = vmatprep.subr.bf16.mxu0 %v819_v20  ;;  %272 = vperm.xlu0 %880, %v268_v51   ;;  %v373_v60 = vld [vmem:[#allocation14] sm:$0xff]  ;;  %v460_v61 = vld [vmem:[#allocation17] sm:$0xff]  ;;  %v372_v15 = vld [vmem:[#allocation13] sm:$0xff] }
  0xc1   :  { %376 = vperm.xlu1 %881, %v373_v60   ;;  %v459_v16 = vld [vmem:[#allocation16] sm:$0xff]  ;;  %v546_v17 = vld [vmem:[#allocation7 + $0x8] sm:$0xff]  ;;  %v548_v18 = vld [vmem:[#allocation7 + $0x18] sm:$0xff] }
  0xc2   :  { %v845_v19 = vpack.c.bf16 %v548_v18, %v546_v17  ;;  %v545_v20 = vld [vmem:[#allocation7] sm:$0xff]  ;;  %v547_v21 = vld [vmem:[#allocation7 + $0x10] sm:$0xff]  ;;  %v550_v23 = vld [vmem:[#allocation7 + $0x28] sm:$0xff] }
  0xc3   :  { %822 = vmatpush3.bf16.msra.mxu0 %v821_v26  ;;  %v847_v22 = vpack.c.bf16 %v547_v21, %v545_v20  ;;  %v552_v24 = vld [vmem:[#allocation7 + $0x38] sm:$0xff]  ;;  %v551_v28 = vld [vmem:[#allocation7 + $0x30] sm:$0xff]  ;;  %v629_v29 = vld [vmem:[#allocation8 + $0x8] sm:$0xff] }
  0xc4   :  { %824 = vmatprep.subr.bf16.mxu0 %v823_v27  ;;  %277 = vperm.xlu0 %880, %v269_v53   ;;  %v849_v26 = vpack.c.bf16 %v552_v24, %v550_v23  ;;  %v549_v27 = vld [vmem:[#allocation7 + $0x20] sm:$0xff]  ;;  %v631_v31 = vld [vmem:[#allocation8 + $0x18] sm:$0xff]  ;;  %v633_v50 = vld [vmem:[#allocation8 + $0x28] sm:$0xff] }
  0xc5   :  { %463 = vperm.xlu1 %881, %v460_v61   ;;  %v851_v30 = vpack.c.bf16 %v551_v28, %v549_v27  ;;  %v628_v47 = vld [vmem:[#allocation8] sm:$0xff]  ;;  %v635_v51 = vld [vmem:[#allocation8 + $0x38] sm:$0xff] }
  0xc6   :  { %v857_v53 = vpack.c.bf16 %v635_v51, %v633_v50 }
  0xc7   :  { %826 = vmatpush3.bf16.msra.mxu0 %v825_v32  ;;  %v853_v32 = vpack.c.bf16 %v631_v31, %v629_v29 }
  0xc8   :  { %828 = vmatprep.subr.bf16.mxu0 %v827_v33 }
  0xcb   :  { %830 = vmatpush3.bf16.msra.mxu0 %v829_v38 }
  0xcc   :  { %832 = vmatprep.subr.bf16.mxu0 %v831_v39 }
  0xcf   :  { %834 = vmatpush3.bf16.msra.mxu0 %v833_v44 }
  0xd0   :  { %836 = vmatprep.subr.bf16.mxu0 %v835_v45 }
  0xd3   :  { %838 = vmatpush3.bf16.msra.mxu0 %v837_v48  ;;  %v630_v48 = vld [vmem:[#allocation8 + $0x10] sm:$0xff] }
  0xd4   :  { %v855_v52 = vpack.c.bf16 %v630_v48, %v628_v47 }
  0xd6   :  { %261 = vmatmul.mubr.f32.vlgmr.msra.gmra.mrb[0].mxu0 %v1358_v49 }
 0x13f   :  { %v273_v62 = vpop.permute.xlu0 %272 }
 0x140   :  { %v377_v33 = vpop.permute.xlu1 %376 }
 0x143   :  { %v278_v63 = vpop.permute.xlu0 %277 }
 0x144   :  { %v464_v38 = vpop.permute.xlu1 %463 }
 0x1a9   :  { %v776_v54 = vpop.f32.mrb[0].mxu0 }
 0x1aa   :  { %v777_v55 = vpop.f32.mrb[1].mxu0 }
 0x1ab   :  { %v778_v56 = vadd.f32 %v777_v55, %v776_v54  ;;  %v632_v54 = vld [vmem:[#allocation8 + $0x20] sm:$0xff]  ;;  %v634_v55 = vld [vmem:[#allocation8 + $0x30] sm:$0xff] }
 0x1ad   :  { %788 = vmatprep.subr.mxu1 %v778_v56 }
 0x1ae   :  { %789 = vmatpush3.msra.mxu1 %v778_v56 }
 0x1af   :  { %791 = vmatmul.mubr.msk.f32.vlgmr.msra.gmra.mrb[0].mxu1 %vm280_vm0, %v267_v57  ;;  %839 = vmatprep.subr.bf16.mxu1 %v1161_v58  ;;  %v859_v57 = vpack.c.bf16 %v634_v55, %v632_v54 }
 0x1b0   :  { %797 = vmatprep.mubr.msk.f32.mxu1 %vm1162_vm1, %v1163_v59 }
 0x282   :  { %v792_v0 = vpop.f32.mrb[0].mxu1 }
 0x283   :  { %v359_v1 = vadd.f32 %v792_v0, %v278_v63  ;;  %v353_v2 = vpop.f32.mrb[1].mxu1 }
 0x284   :  { %v354_v3 = vadd.f32 %v353_v2, %v273_v62 }
 0x285   :  { %v363_v4 = vadd.f32 3.0, %v359_v1 }
 0x286   :  { %v362_v5 = vadd.f32 3.0, %v354_v3 }
 0x287   :  { %v365_v6 = vmax.f32 %v363_v4, 0.0 }
 0x288   :  { %v364_v7 = vmax.f32 %v362_v5, 0.0 }
 0x289   :  { %v367_v8 = vmin.f32 %v365_v6, 6.0 }
 0x28a   :  { %v366_v9 = vmin.f32 %v364_v7, 6.0 }
 0x28b   :  { %v369_v10 = vmul.f32 0.16666667, %v367_v8 }
 0x28c   :  { %v368_v11 = vmul.f32 0.16666667, %v366_v9 }
 0x28d   :  { %v371_v12 = vmul.f32 %v369_v10, %v359_v1 }
 0x28e   :  { %v370_v13 = vmul.f32 %v368_v11, %v354_v3 }
 0x290   :  { %v840_v14 = vpack.c.bf16 %v371_v12, %v370_v13 }
 0x292   :  { %841 = vmatpush3.bf16.msra.mxu1 %v840_v14 }
 0x293   :  { %842 = vmatprep.subr.bf16.mxu1 %v1161_v58 }
 0x295   :  { %798 = vmatmul.mubr.msk.f32.vlgmr.msra.gmra.mrb[2].mxu1 %vm379_vm2, %v372_v15 }
 0x296   :  { %844 = vmatpush3.bf16.msra.mxu1 %v840_v14  ;;  %804 = vmatprep.mubr.msk.f32.mxu1 %vm1162_vm1, %v1163_v59 }
 0x297   :  { %846 = vmatprep.subr.bf16.mxu1 %v845_v19 }
 0x299   :  { %805 = vmatmul.mubr.msk.f32.vlgmr.msra.gmra.mrb[4].mxu1 %vm379_vm2, %v459_v16 }
 0x29a   :  { %621 = vmatprep.mubr.f32.mxu1 %v1163_v59  ;;  %848 = vmatpush1.bf16.msra.mxu1 %v847_v22 }
 0x29b   :  { %850 = vmatprep.subr.bf16.mxu1 %v849_v26 }
 0x29e   :  { %852 = vmatpush1.bf16.msra.mxu1 %v851_v30 }
 0x29f   :  { %854 = vmatprep.subr.bf16.mxu1 %v853_v32 }
 0x368   :  { %v449_v34 = vpop.f32.mrb[2].mxu1 }
 0x369   :  { %v450_v35 = vadd.f32 %v449_v34, %v377_v33  ;;  %v799_v36 = vpop.f32.mrb[3].mxu1 }
 0x36b   :  { %v739_v37 = vmul.f32 -1.442695, %v450_v35 }
 0x36c   :  { %v535_v39 = vpop.f32.mrb[4].mxu1 }
 0x36d   :  { %882 = vpow2.f32 %v739_v37  ;;  %v536_v40 = vadd.f32 %v535_v39, %v464_v38  ;;  %v806_v41 = vpop.f32.mrb[5].mxu1 }
 0x36f   :  { %v741_v42 = vmul.f32 -1.442695, %v536_v40 }
 0x371   :  { %884 = vpow2.f32 %v741_v42 }
 0x377   :  { %v883_v43 = vpop.eup %882 }
 0x378   :  { %v456_v44 = vadd.f32 1.0, %v883_v43 }
 0x37a   :  { %886 = vrcp.f32 %v456_v44 }
 0x37b   :  { %v885_v45 = vpop.eup %884 }
 0x37c   :  { %v542_v46 = vadd.f32 1.0, %v885_v45 }
 0x37e   :  { %888 = vrcp.f32 %v542_v46 }
 0x384   :  { %v887_v56 = vpop.eup %886 }
 0x385   :  { %742 = vmatmul.mubr.msk.f32.vlgmr.msra.gmra.mrb[6].mxu1 %vm553_vm3, %v887_v56 }
 0x386   :  { %856 = vmatpush1.bf16.msra.mxu1 %v855_v52  ;;  %703 = vmatprep.mubr.f32.mxu1 %v1163_v59 }
 0x387   :  { %858 = vmatprep.subr.bf16.mxu1 %v857_v53 }
 0x388   :  { %v889_v58 = vpop.eup %888 }
 0x38a   :  { %860 = vmatpush1.bf16.msra.mxu1 %v859_v57 }
 0x38d   :  { %743 = vmatmul.mubr.msk.f32.vlgmr.msra.gmra.mrb[8].mxu1 %vm553_vm3, %v889_v58 }
 0x458   :  { %v623_v60 = vpop.f32.mrb[6].mxu1 }
 0x459   :  { %v625_v61 = vpop.f32.mrb[7].mxu1 }
 0x460   :  { %v705_v62 = vpop.f32.mrb[8].mxu1 }
 0x461   :  { %v710_v63 = vmul.f32 %v705_v62, %v623_v60  ;;  %v707_v0 = vpop.f32.mrb[9].mxu1 }
 0x462   :  { %v711_v1 = vmul.f32 %v707_v0, %v625_v61 }
 0x463   :  { %v712_v2 = vmul.f32 %v710_v63, %v1358_v49 }
 0x464   :  { %v713_v3 = vmul.f32 %v711_v1, %v1355_v25 }
 0x465   :  { %714 = vst [vmem:[#allocation19] sm:$0xff] %v712_v2 }
 0x466   :  { %715 = vst [vmem:[#allocation19 + $0x8] sm:$0xff] %v713_v3 }
 0x467   :  { %1121 = shalt.err (!%p1118_p0)
}
 0x468   :  { %s1122_s4 = scalar_lea.hbm %s1391_s10, 256 }
 0x469   :  { %p1123_p1 = scmp.ne.s32.totalorder %s1391_s10, %s1122_s4  ;;  %p1126_p2 = scmp.lt.u32.totalorder %s1122_s4, %s1391_s10 }
 0x46b   :  { %p1128_p3 = pnand %p1126_p2, %p1123_p1 }
 0x46d   :  { %1131 = shalt.err (!%p1128_p3)
}
 0x46e   :  { %725 = dma.vmem_to_hbm [thread:$0]  %s723_s29, 256, %s1391_s10, [#allocation4]  }
 0x46f   :  { %1144 = dma.done.wait [#allocation4], 256  }
 0x470   :  { %1145 = vsyncadd [#allocation4], 4294967040 }
 0x471   :  { %729 = vsyncpa [#allocation3], 1 }
 0x472   :  { %730 = vsyncpa [#allocation6], 1 }
 0x473   :  { %731 = vsyncpa [#allocation9], 1 }
 0x474   :  { %732 = vsyncpa [#allocation12], 1 }
 0x475   :  { %733 = vsyncpa [#allocation15], 1 }
 0x476   :  { %734 = vsyncpa [#allocation18], 1 }
 0x477   :  { %735 = vsyncpa [#allocation4], 1 }

</bundles_post_ra>
